<compile_context>
chip_gen: v7x
topology: tpu7x:2x2x1
jax: 0.10.0
libtpu: 0.0.40
codegen_flags: <defaults>
</compile_context>

<pallas_src>
import functools
import math

import jax
import jax.numpy as jnp
from jax import lax
from jax.experimental import pallas as pl
from jax.experimental.pallas import tpu as pltpu


_PREFIX_SUM_MIN_K = 12          # taps >= this switch to the log2(L) prefix-sum path
_MIN_GRID_STEPS = 4             # keep >=4 grid steps for pipelining / v7x dual core


def _decomp_kernel(x_ref, seas_ref, trend_ref, *, kernel_size, seq_len,
                   front_pad, end_pad, use_prefix_sum):
    """One (seq_len x channel_tile) tile; time on sublanes, channels on lanes."""
    L = seq_len
    C = x_ref.shape[-1]

    xf = x_ref[...].astype(jnp.float32)       # (L, C) f32 working copy
    first = xf[0:1, :]                        # replicate-pad edge rows
    last = xf[L - 1:L, :]

    if use_prefix_sum:
        # Inclusive cumulative sum along time via ceil(log2(L)) shift+add steps,
        # then window-sum = cs[min(L-1, t+ep)] - cs[t-fp-1], with the replicate
        # padding applied as two iota-masked boundary corrections.
        cs = xf
        s = 1
        while s < L:
            shifted = jnp.concatenate(
                [jnp.zeros((s, C), jnp.float32), cs[:L - s, :]], axis=0)
            cs = cs + shifted
            s *= 2

        if end_pad == 0:
            hi = cs
        elif end_pad >= L:
            hi = jnp.broadcast_to(cs[L - 1:L, :], (L, C))
        else:
            hi = jnp.concatenate(
                [cs[end_pad:, :],
                 jnp.broadcast_to(cs[L - 1:L, :], (end_pad, C))], axis=0)

        lo_shift = front_pad + 1
        if lo_shift >= L:
            lo = jnp.zeros((L, C), jnp.float32)
        else:
            lo = jnp.concatenate(
                [jnp.zeros((lo_shift, C), jnp.float32), cs[:L - lo_shift, :]],
                axis=0)

        t_idx = lax.broadcasted_iota(jnp.int32, (L, C), 0)
        cnt_front = jnp.maximum(front_pad - t_idx, 0).astype(jnp.float32)
        cnt_end = jnp.maximum(t_idx - (L - 1 - end_pad), 0).astype(jnp.float32)
        acc = (hi - lo) + cnt_front * first + cnt_end * last
    else:
        # Direct tap accumulation: clamp-shifted slices read straight from the
        # pipelined input tile (input dtype), replicate padding folded into the
        # edge-row broadcasts.  A few interleaved partials keep the add chain short.
        n_acc = min(4, kernel_size)
        partials = [None] * n_acc
        for j in range(kernel_size):
            d = j - front_pad
            if d == 0:
                contrib = xf
            elif d > 0:
                if d >= L:
                    contrib = jnp.broadcast_to(last, (L, C))
                else:
                    body = x_ref[pl.ds(d, L - d), :].astype(jnp.float32)
                    contrib = jnp.concatenate(
                        [body, jnp.broadcast_to(last, (d, C))], axis=0)
            else:
                nd = -d
                if nd >= L:
                    contrib = jnp.broadcast_to(first, (L, C))
                else:
                    body = x_ref[pl.ds(0, L - nd), :].astype(jnp.float32)
                    contrib = jnp.concatenate(
                        [jnp.broadcast_to(first, (nd, C)), body], axis=0)
            i = j % n_acc
            partials[i] = contrib if partials[i] is None else partials[i] + contrib
        while len(partials) > 1:
            nxt = [partials[i] + partials[i + 1]
                   for i in range(0, len(partials) - 1, 2)]
            if len(partials) % 2:
                nxt.append(partials[-1])
            partials = nxt
        acc = partials[0]

    trend = acc * (1.0 / kernel_size)
    trend_ref[...] = trend.astype(trend_ref.dtype)
    seas_ref[...] = (xf - trend).astype(seas_ref.dtype)


def _vmem_plan():
    """Per-generation scoped-VMEM limit and per-step tile budget."""
    try:
        cap = int(pltpu.get_tpu_info().vmem_capacity_bytes)
    except Exception:                      # info unavailable -> assume smallest (v7x)
        cap = 64 << 20
    vmem_limit = min(cap // 2, 96 << 20)   # ~32 MiB on v7x, 64 MiB on v5e/v6e
    tile_budget = int(vmem_limit * 0.6)    # headroom for compiler-internal scratch
    return vmem_limit, tile_budget


def _choose_channel_tile(batch, channels, seq_len, itemsize, budget):
    """Pick a lane-dense channel tile that fits the VMEM budget.
    Returns (tile, padded_channels); padded_channels > channels only when a
    full-C block would not fit and C is not a multiple of 128."""

    def bytes_for(t):
        io = 3 * seq_len * t * itemsize * 2   # (1 in + 2 out) blocks, double-buffered
        tmp = 8 * seq_len * t * 4             # f32 working set (x, partials/cumsum, ...)
        return io + tmp

    if channels % 128 != 0:
        if bytes_for(channels) <= budget:
            return channels, channels         # full-C block is legal for any C
        c_pad = ((channels + 127) // 128) * 128
    else:
        c_pad = channels

    cands = [t for t in range(128, c_pad + 1, 128)
             if c_pad % t == 0 and bytes_for(t) <= budget]
    if not cands:
        return 128, c_pad                     # smallest legal lane-dense tile
    tile = max(cands)
    while batch * (c_pad // tile) < _MIN_GRID_STEPS:
        smaller = [t for t in cands if t < tile]
        if not smaller:
            break
        tile = max(smaller)
    return tile, c_pad


def series_decomp(x, kernel_size):
    """x: (B, L, C) -> (seasonality, trend), both (B, L, C).
    Matches PyTorch series_decomp: trend = AvgPool1d(k, stride=1) over a
    replicate-padded series, seasonality = x - trend."""
    B, L, C = x.shape
    front_pad = (kernel_size - 1) // 2
    end_pad = kernel_size // 2
    itemsize = jnp.dtype(x.dtype).itemsize

    vmem_limit, tile_budget = _vmem_plan()
    tile, c_pad = _choose_channel_tile(B, C, L, itemsize, tile_budget)

    xin = x if c_pad == C else jnp.pad(x, ((0, 0), (0, 0), (0, c_pad - C)))

    use_prefix = (kernel_size >= _PREFIX_SUM_MIN_K) and L > 1
    kernel = functools.partial(
        _decomp_kernel, kernel_size=kernel_size, seq_len=L,
        front_pad=front_pad, end_pad=end_pad, use_prefix_sum=use_prefix)

    block = (None, L, tile)
    idx_map = lambda b, c: (b, 0, c)
    grid = (B, c_pad // tile)

    flops_per_elem = (math.ceil(math.log2(max(L, 2))) + 8) if use_prefix \
        else (kernel_size + 2)
    cost = pl.CostEstimate(
        flops=flops_per_elem * xin.size,
        transcendentals=0,
        bytes_accessed=3 * xin.size * itemsize)   # read x + write 2 outputs

    seas, trend = pl.pallas_call(
        kernel,
        out_shape=(
            jax.ShapeDtypeStruct(xin.shape, x.dtype),
            jax.ShapeDtypeStruct(xin.shape, x.dtype),
        ),
        grid_spec=pltpu.PrefetchScalarGridSpec(
            num_scalar_prefetch=0,
            grid=grid,
            in_specs=[pl.BlockSpec(block, idx_map)],
            out_specs=[pl.BlockSpec(block, idx_map), pl.BlockSpec(block, idx_map)],
        ),
        compiler_params=pltpu.CompilerParams(
            dimension_semantics=("parallel", "parallel"),
            vmem_limit_bytes=vmem_limit),
        cost_estimate=cost,
    )(xin)

    if c_pad != C:
        seas = seas[:, :, :C]
        trend = trend[:, :, :C]
    return seas, trend


def _reference(x, kernel_size):
    """Pure-JAX reference mirroring the PyTorch semantics."""
    B, L, C = x.shape
    front = jnp.repeat(x[:, 0:1, :], (kernel_size - 1) // 2, axis=1)
    end = jnp.repeat(x[:, L - 1:L, :], kernel_size // 2, axis=1)
    xpad = jnp.concatenate([front, x, end], axis=1)
    windows = jnp.stack([xpad[:, j:j + L, :] for j in range(kernel_size)], axis=0)
    trend = jnp.mean(windows, axis=0)
    return x - trend, trend


def _check(x, kernel_size):
    seas, trend = series_decomp(x, kernel_size)
    jax.block_until_ready((seas, trend))
    seas_ref, trend_ref = _reference(x, kernel_size)
    assert jnp.allclose(seas, seas_ref, atol=1e-5), f"seasonality mismatch (k={kernel_size})"
    assert jnp.allclose(trend, trend_ref, atol=1e-5), f"trend mismatch (k={kernel_size})"
    assert jnp.allclose(seas + trend, x, atol=1e-5), "decomposition does not sum to x"


if __name__ == "__main__":
    key = jax.random.PRNGKey(0)
    k1, k2 = jax.random.split(key)

    # Small-C path: (B, L, C) kept as-is, masked lane stores, direct tap path.
    x_small = jax.random.normal(k1, (2, 16, 8), dtype=jnp.float32)
    _check(x_small, kernel_size=5)
    _check(x_small, kernel_size=1)   # degenerate kernel: trend == x, seasonality == 0

    # Lane-dense-C path: 128-lane channel tile, large-k prefix-sum path.
    x_dense = jax.random.normal(k2, (2, 16, 128), dtype=jnp.float32)
    _check(x_dense, kernel_size=25)

    print("KERNEL_OK")
</pallas_src>

<mosaic_0001>
module attributes {stable_mosaic.version = 11 : i64} {
  func.func @_decomp_kernel(%arg0: i32, %arg1: i32, %arg2: memref<1x16x8xf32, #tpu.memory_space<vmem>>, %arg3: memref<1x16x8xf32, #tpu.memory_space<vmem>>, %arg4: memref<1x16x8xf32, #tpu.memory_space<vmem>>) attributes {dimension_semantics = [#tpu.dimension_semantics<parallel>, #tpu.dimension_semantics<parallel>], iteration_bounds = array<i64: 2, 1>, scalar_prefetch = 0 : i64, scratch_operands = 0 : i64, tpu.core_type = #tpu.core_type<tc>, window_params = [{transform_indices = @transform_0, window_bounds = array<i64: 1, 16, 8>}, {transform_indices = @transform_1, window_bounds = array<i64: 1, 16, 8>}, {transform_indices = @transform_2, window_bounds = array<i64: 1, 16, 8>}]} {
    %c0 = arith.constant 0 : index
    %c0_0 = arith.constant 0 : index
    %c0_1 = arith.constant 0 : index
    %0 = vector.load %arg2[%c0, %c0_0, %c0_1] : memref<1x16x8xf32, #tpu.memory_space<vmem>>, vector<1x16x8xf32>
    %1 = vector.shape_cast %0 : vector<1x16x8xf32> to vector<16x8xf32>
    %2 = vector.extract_strided_slice %1 {offsets = [0, 0], sizes = [1, 8], strides = [1, 1]} : vector<16x8xf32> to vector<1x8xf32>
    %3 = vector.extract_strided_slice %1 {offsets = [15, 0], sizes = [1, 8], strides = [1, 1]} : vector<16x8xf32> to vector<1x8xf32>
    %c0_2 = arith.constant 0 : index
    %c0_3 = arith.constant 0 : index
    %c0_4 = arith.constant 0 : index
    %4 = vector.load %arg2[%c0_2, %c0_3, %c0_4] : memref<1x16x8xf32, #tpu.memory_space<vmem>>, vector<1x14x8xf32>
    %5 = vector.shape_cast %4 : vector<1x14x8xf32> to vector<14x8xf32>
    %6 = vector.shape_cast %2 : vector<1x8xf32> to vector<1x8xf32>
    %7 = vector.broadcast %6 : vector<1x8xf32> to vector<2x8xf32>
    %8 = tpu.concatenate %7, %5 in 0 : vector<2x8xf32>, vector<14x8xf32> -> vector<16x8xf32>
    %c0_5 = arith.constant 0 : index
    %c0_6 = arith.constant 0 : index
    %c0_7 = arith.constant 0 : index
    %9 = vector.load %arg2[%c0_5, %c0_6, %c0_7] : memref<1x16x8xf32, #tpu.memory_space<vmem>>, vector<1x15x8xf32>
    %10 = vector.shape_cast %9 : vector<1x15x8xf32> to vector<15x8xf32>
    %11 = tpu.concatenate %2, %10 in 0 : vector<1x8xf32>, vector<15x8xf32> -> vector<16x8xf32>
    %c0_8 = arith.constant 0 : index
    %c1 = arith.constant 1 : index
    %c0_9 = arith.constant 0 : index
    %12 = vector.load %arg2[%c0_8, %c1, %c0_9] : memref<1x16x8xf32, #tpu.memory_space<vmem>>, vector<1x15x8xf32>
    %13 = vector.shape_cast %12 : vector<1x15x8xf32> to vector<15x8xf32>
    %14 = tpu.concatenate %13, %3 in 0 : vector<15x8xf32>, vector<1x8xf32> -> vector<16x8xf32>
    %c0_10 = arith.constant 0 : index
    %c2 = arith.constant 2 : index
    %c0_11 = arith.constant 0 : index
    %15 = vector.load %arg2[%c0_10, %c2, %c0_11] : memref<1x16x8xf32, #tpu.memory_space<vmem>>, vector<1x14x8xf32>
    %16 = vector.shape_cast %15 : vector<1x14x8xf32> to vector<14x8xf32>
    %17 = vector.shape_cast %3 : vector<1x8xf32> to vector<1x8xf32>
    %18 = vector.broadcast %17 : vector<1x8xf32> to vector<2x8xf32>
    %19 = tpu.concatenate %16, %18 in 0 : vector<14x8xf32>, vector<2x8xf32> -> vector<16x8xf32>
    %20 = arith.addf %8, %19 : vector<16x8xf32>
    %21 = arith.addf %20, %11 : vector<16x8xf32>
    %22 = arith.addf %1, %14 : vector<16x8xf32>
    %23 = arith.addf %21, %22 : vector<16x8xf32>
    %cst = arith.constant 2.000000e-01 : f32
    %24 = vector.broadcast %cst : f32 to vector<16x8xf32>
    %25 = arith.mulf %23, %24 : vector<16x8xf32>
    %c0_12 = arith.constant 0 : index
    %c0_13 = arith.constant 0 : index
    %c0_14 = arith.constant 0 : index
    %26 = vector.load %arg4[%c0_12, %c0_13, %c0_14] : memref<1x16x8xf32, #tpu.memory_space<vmem>>, vector<1x16x8xf32>
    %27 = vector.shape_cast %26 : vector<1x16x8xf32> to vector<16x8xf32>
    %28 = vector.shape_cast %25 : vector<16x8xf32> to vector<1x16x8xf32>
    tpu.vector_store %arg4[%c0_12, %c0_13, %c0_14], %28 {strides = array<i32>} : memref<1x16x8xf32, #tpu.memory_space<vmem>>, vector<1x16x8xf32>,
    %29 = arith.subf %1, %25 : vector<16x8xf32>
    %c0_15 = arith.constant 0 : index
    %c0_16 = arith.constant 0 : index
    %c0_17 = arith.constant 0 : index
    %30 = vector.load %arg3[%c0_15, %c0_16, %c0_17] : memref<1x16x8xf32, #tpu.memory_space<vmem>>, vector<1x16x8xf32>
    %31 = vector.shape_cast %30 : vector<1x16x8xf32> to vector<16x8xf32>
    %32 = vector.shape_cast %29 : vector<16x8xf32> to vector<1x16x8xf32>
    tpu.vector_store %arg3[%c0_15, %c0_16, %c0_17], %32 {strides = array<i32>} : memref<1x16x8xf32, #tpu.memory_space<vmem>>, vector<1x16x8xf32>,
    return
  }
  func.func @transform_0(%arg0: i32, %arg1: i32) -> (i32, i32, i32) {
    %c0_i32 = arith.constant 0 : i32
    %c0_i32_0 = arith.constant 0 : i32
    return %arg0, %c0_i32, %arg1 : i32, i32, i32
  }
  func.func @transform_1(%arg0: i32, %arg1: i32) -> (i32, i32, i32) {
    %c0_i32 = arith.constant 0 : i32
    %c0_i32_0 = arith.constant 0 : i32
    return %arg0, %c0_i32, %arg1 : i32, i32, i32
  }
  func.func @transform_2(%arg0: i32, %arg1: i32) -> (i32, i32, i32) {
    %c0_i32 = arith.constant 0 : i32
    %c0_i32_0 = arith.constant 0 : i32
    return %arg0, %c0_i32, %arg1 : i32, i32, i32
  }
}

</mosaic_0001>

<bundles_post_ra>
// kernel: tpu_custom_call.1
= control target key start
LH: loop header
LB: loop body
LE: loop exit
PB: predicated region body
PF: predicated region fallthrough
CT: control target
= control target key end

     0   :  { %s459_s9 = smov 0   ;;  %s461_s10 = smov 0   ;;  %s505_s0 = inlined_call_operand.vmem [shape: f32[2,16,8], index: 0, kind: input, shape index: {}]   ;;  %s506_s1 = inlined_call_operand.vmem [shape: f32[2,16,8], index: 1, kind: output, shape index: {0}]   ;;  %s507_s2 = inlined_call_operand.vmem [shape: f32[2,16,8], index: 2, kind: output, shape index: {1}]  }
   0x1   :  { %s463_s11 = smov 0  }
   0x2 LB: > { %s25_s12 = sadd.s32 1, %s438_s10  ;;  %p384_p0 = scmp.ge.s32.totalorder %s442_s11, 1  ;;  %s442_s11 = sphi %s463_s11, %s13_s11   ;;  %s438_s10 = sphi %s461_s10, %s509_s10   ;;  %s434_s9 = sphi %s459_s9, %s508_s9  }
   0x3   : > { %p27_p1 = scmp.ge.s32.totalorder %s25_s12, 2  ;;  %p136_p2 = scmp.lt.s32.totalorder %s442_s11, 3 }
   0x5   : > { %s511_s12 = smov (%p27_p1, %s25_s12), 0  ;;  %p137_p3 = pnand %p384_p0, %p136_p2 }
   0x6   : > { %p172_p4 = scmp.lt.s32.totalorder (!%p137_p3), %s434_s9, 1  ;;  %v199_v0 = vlaneseq (!%p137_p3)  ;;  %vm205_vm0 = vcmask (!%p137_p3), 1041408   ;;  %vm214_vm1 = vcmask (!%p137_p3), 1040384   ;;  %vm223_vm2 = vcmask (!%p137_p3), 1046528  }
   0x7   : > { %140 = sbr.rel (%p137_p3) target bundleno = 35 (0x23), region = 24  ;;  %vm231_vm3 = vcmask (!%p137_p3), 1045504   ;;  %vm243_vm4 = vcmask (!%p137_p3), 64512  }
   0x8   : > { %v200_v1 = vshrl.u32 (!%p137_p3), %v199_v0, 7 }
   0xa   : > { %v201_v2 = vsub.s32 (!%p137_p3), 0, %v200_v1  ;;  %v229_v3 = vsub.s32 (!%p137_p3), 7, %v200_v1 }
   0xe   : > { %s513_s9 = smov (!%p172_p4, %s434_s9), 1 }
   0xf   : > { %s477_s13 = sshll.u32 %s513_s9, 4 }
  0x10   : > { %s179_s16 = scalar_lea.vmem %s505_s0, %s477_s13  ;;  %s195_s19 = scalar_lea.vmem %s507_s2, %s477_s13 }
  0x11   : > { %v196_v4 = vld [vmem:[%s179_s16] sm:$0xff]  ;;  %v197_v10 = vld [vmem:[%s179_s16 + $0x8] sm:$0xff]  ;;  %s187_s22 = scalar_lea.vmem %s506_s1, %s477_s13 }
  0x12   : > { %v221_v5 = vld [vmem:[%s179_s16 + $0x1] sm:$0xff]  ;;  %v202_v6 = vrot.slane %v196_v4, %v201_v2  ;;  %v206_v7 = vrot.slane %v196_v4, 6  ;;  %v215_v8 = vrot.slane %v196_v4, 7  ;;  %v222_v14 = vld [vmem:[%s179_s16 + $0x9] sm:$0x7f]  ;;  %v230_v15 = vrot.slane %v197_v10, %v229_v3 }
  0x13   : > { %v225_v9 = vld [vmem:[%s179_s16 + $0x2] sm:$0xff]  ;;  %v224_v19 = vsel %vm223_vm2, %v222_v14, %v197_v10  ;;  %v226_v20 = vld [vmem:[%s179_s16 + $0xa] sm:$0x3f]  ;;  %v237_v22 = vadd.f32 %v221_v5, %v196_v4 }
  0x14   : > { %v198_v11 = vld [vmem:[%s179_s16 + $0x8] sm:$0x3f]  ;;  %v211_v16 = vsel %vm205_vm0, %v202_v6, %v206_v7  ;;  %v220_v17 = vsel %vm214_vm1, %v196_v4, %v215_v8  ;;  %v232_v24 = vsel %vm231_vm3, %v226_v20, %v230_v15  ;;  %v238_v27 = vadd.f32 %v224_v19, %v197_v10 }
  0x15   : > { %v207_v12 = vrot.slane %v198_v11, 6  ;;  %v212_v13 = vld [vmem:[%s179_s16 + $0x8] sm:$0x7f]  ;;  %v233_v21 = vadd.f32 %v225_v9, %v211_v16 }
  0x16   : > { %v216_v18 = vrot.slane %v212_v13, 7 }
  0x17   : > { %v208_v23 = vsel %vm205_vm0, %v206_v7, %v207_v12  ;;  %v235_v28 = vadd.f32 %v233_v21, %v220_v17 }
  0x18   : > { %v217_v25 = vsel %vm214_vm1, %v215_v8, %v216_v18  ;;  %v234_v26 = vadd.f32 %v232_v24, %v208_v23 }
  0x19   : > { %v239_v30 = vadd.f32 %v237_v22, %v235_v28 }
  0x1a   : > { %v236_v29 = vadd.f32 %v234_v26, %v217_v25 }
  0x1b   : > { %v241_v32 = vmul.f32 0.2, %v239_v30 }
  0x1c   : > { %v240_v31 = vadd.f32 %v238_v27, %v236_v29 }
  0x1d   : > { %244 = vst.msk [vmem:[%s195_s19] sm:$0xff] %vm243_vm4, %v241_v32  ;;  %v246_v34 = vsub.f32 %v196_v4, %v241_v32 }
  0x1e   : > { %v242_v33 = vmul.f32 0.2, %v240_v31 }
  0x1f   : > { %248 = vst.msk [vmem:[%s187_s22] sm:$0xff] %vm243_vm4, %v246_v34 }
  0x20   : > { %245 = vst.msk [vmem:[%s195_s19 + $0x8] sm:$0xff] %vm243_vm4, %v242_v33  ;;  %v247_v35 = vsub.f32 %v197_v10, %v242_v33 }
  0x22   : > { %249 = vst.msk [vmem:[%s187_s22 + $0x8] sm:$0xff] %vm243_vm4, %v247_v35 }
  0x23 PF: > { %s13_s11 = sadd.s32 1, %s442_s11   ;;  %s508_s9 = smov %s438_s10 }
  0x24   : > { %p10_p5 = scmp.ge.s32.totalorder %s13_s11, 4   ;;  %s509_s10 = smov %s511_s12 }
  0x26   :  { %12 = sbr.rel (!%p10_p5) target bundleno = 2 (0x2), region = 66 }

</bundles_post_ra>
